<compile_context>
chip_gen: v7x
topology: tpu7x:2x2x1
jax: 0.10.0
libtpu: 0.0.40
codegen_flags: <defaults>
</compile_context>

<pallas_src>
import functools

import jax
import jax.numpy as jnp
from jax import lax
from jax.experimental import pallas as pl
from jax.experimental.pallas import tpu as pltpu


def _dice_accum_kernel(logits_ref, targets_ref, inter_ref, union_ref, *,
                       ignore_index: int, hw: int):
    j = pl.program_id(2)

    # Per-(image, pixel-half) accumulators are resident across the pixel-tile
    # axis; zero them on its first step.
    @pl.when(j == 0)
    def _():
        inter_ref[...] = jnp.zeros_like(inter_ref)
        union_ref[...] = jnp.zeros_like(union_ref)

    x = logits_ref[0].astype(jnp.float32)       # (C, TP): classes on sublanes
    t = targets_ref[0].astype(jnp.int32)        # (1, TP): pixels on lanes
    num_classes = x.shape[0]
    tile_p = t.shape[-1]

    # Global pixel index of every lane of this block (handles the ragged tail
    # and the fully-out-of-range duplicate block produced by index clamping).
    blk = pl.program_id(1) * pl.num_programs(2) + j
    pix = blk * tile_p + lax.broadcasted_iota(jnp.int32, t.shape, 1)
    in_bounds = pix < hw                                         # (1, TP)

    # targets >= num_classes -> ignore_index (matches the PyTorch module).
    t = jnp.where(t >= num_classes, jnp.int32(ignore_index), t)
    valid = (t != jnp.int32(ignore_index)) & in_bounds           # (1, TP)
    safe_t = jnp.where(valid, t, jnp.int32(0))                   # (1, TP)

    # Softmax over the class (sublane) axis.
    m = jnp.max(x, axis=0, keepdims=True)        # (1, TP)
    e = jnp.exp(x - m)                           # (C, TP)
    s = jnp.sum(e, axis=0, keepdims=True)        # (1, TP)
    p = e * pl.reciprocal(s, approx=False)       # exact: parity with the module

    # One-hot via sublane iota.  Fold the validity mask in before accumulation
    # so garbage lanes (possibly NaN/Inf after exp) can never leak in.
    classes = lax.broadcasted_iota(jnp.int32, x.shape, 0)        # (C, TP)
    hit = (classes == safe_t) & valid                            # (C, TP) bool
    one_hot = hit.astype(jnp.float32)                            # (C, TP)
    p_valid = jnp.where(valid, p, 0.0)                           # (C, TP)

    inter_ref[0, 0] += jnp.sum(jnp.where(hit, p, 0.0), axis=1, keepdims=True)
    # Fused union reduction: one cross-lane reduce instead of two.
    union_ref[0, 0] += jnp.sum(p_valid + one_hot, axis=1, keepdims=True)


def _vmem_limit_bytes() -> int:
    """Generation-aware scoped-VMEM limit (conservative, v7x-safe fallback)."""
    phys = 64 << 20                    # v7x physical VMEM (smallest of the three)
    try:
        info = pltpu.get_tpu_info()
        phys = int(getattr(info, "vmem_capacity_bytes", phys)) or phys
    except Exception:
        pass
    # Leave headroom for Mosaic internal scratch; never request more than 100 MiB.
    return int(min(phys * 3 // 4, 100 << 20))


_TARGET_BLOCK_BYTES = 2 << 20        # aim for ~2 MiB logits block per grid step
_LIVE_F32_INTERMEDIATES = 10         # conservative count of live (C, TP) f32 arrays


def _plan_tiles(C, HW, logit_bytes, target_bytes, tile_override):
    vmem_limit = _vmem_limit_bytes()
    if tile_override is not None:
        tile_p = max(128, (int(tile_override) // 128) * 128)
    else:
        per_px = (C * (2 * logit_bytes + 4 * _LIVE_F32_INTERMEDIATES)
                  + 2 * target_bytes)
        by_vmem = (vmem_limit * 3 // 5) // max(per_px, 1)
        by_target = _TARGET_BLOCK_BYTES // max(C * logit_bytes, 1)
        tile_p = max(128, (min(by_vmem, by_target) // 128) * 128)
    if HW <= tile_p:
        tile_p = HW                    # single exact tile, no in-kernel tail
    nb = pl.cdiv(HW, tile_p)           # true number of pixel blocks
    split = 2 if nb >= 2 else 1        # second parallel axis for v7x megacore
    steps = pl.cdiv(nb, split)         # inner (reduction) grid extent
    return tile_p, nb, split, steps, vmem_limit


@functools.partial(
    jax.jit,
    static_argnames=("smooth", "ignore_index", "tile_p", "nb", "split", "steps",
                     "vmem_limit"))
def _dice_loss_impl(logits, targets, *, smooth, ignore_index, tile_p, nb, split,
                    steps, vmem_limit):
    N, C, H, W = logits.shape
    HW = H * W

    # Free reshapes only: no transpose, no pad, no dtype change of either input.
    x = logits.reshape(N, C, HW)
    t = targets.reshape(N, 1, HW)      # keep the caller's (narrow) int dtype

    last_blk = nb - 1

    def in_map(n, s, j):
        # Clamp: the padded (split*steps - nb) trailing steps re-read the last
        # block; the kernel masks them out entirely via the global pixel index.
        return (n, 0, jnp.minimum(s * steps + j, last_blk))

    def out_map(n, s, j):
        return (n, s, 0, 0)

    kernel = functools.partial(_dice_accum_kernel, ignore_index=ignore_index,
                               hw=HW)

    inter, union = pl.pallas_call(
        kernel,
        out_shape=(jax.ShapeDtypeStruct((N, split, C, 1), jnp.float32),
                   jax.ShapeDtypeStruct((N, split, C, 1), jnp.float32)),
        grid_spec=pltpu.PrefetchScalarGridSpec(
            num_scalar_prefetch=0,
            grid=(N, split, steps),
            in_specs=[
                pl.BlockSpec((1, C, tile_p), in_map),
                pl.BlockSpec((1, 1, tile_p), in_map),
            ],
            out_specs=[
                pl.BlockSpec((1, 1, C, 1), out_map),
                pl.BlockSpec((1, 1, C, 1), out_map),
            ],
        ),
        compiler_params=pltpu.CompilerParams(
            dimension_semantics=("parallel", "parallel", "arbitrary"),
            vmem_limit_bytes=vmem_limit),
    )(x, t)

    # Tiny epilogue in plain JAX: reduce per-(image, half) partials, form loss.
    inter = jnp.sum(inter.reshape(N * split, C), axis=0)
    union = jnp.sum(union.reshape(N * split, C), axis=0)
    dice = (2.0 * inter + smooth) / (union + smooth)
    return (1.0 - jnp.mean(dice)).astype(jnp.float32)


def dice_loss(logits, targets, *, smooth=1.0, ignore_index=255, tile=None):
    """Pallas implementation of DiceLoss.forward.

    logits:  (N, C, H, W) float (any float dtype; accumulated in f32 in-kernel)
    targets: (N, H, W) integer (any int dtype; cast in-kernel, never on host)
    returns: scalar float32 loss
    """
    N, C, H, W = logits.shape
    HW = H * W
    tile_p, nb, split, steps, vmem_limit = _plan_tiles(
        C, HW, jnp.dtype(logits.dtype).itemsize,
        jnp.dtype(targets.dtype).itemsize, tile)
    return _dice_loss_impl(logits, targets, smooth=float(smooth),
                           ignore_index=int(ignore_index), tile_p=tile_p, nb=nb,
                           split=split, steps=steps, vmem_limit=vmem_limit)


def _dice_loss_ref(logits, targets, *, smooth=1.0, ignore_index=255):
    """Pure-JAX reference mirroring the PyTorch module."""
    num_classes = logits.shape[1]
    t = targets.astype(jnp.int32)
    probs = jax.nn.softmax(logits.astype(jnp.float32), axis=1)
    t = jnp.where(t >= num_classes, ignore_index, t)
    valid = t != ignore_index
    safe_t = jnp.where(valid, t, 0)
    one_hot = jax.nn.one_hot(safe_t, num_classes, dtype=jnp.float32)
    one_hot = jnp.transpose(one_hot, (0, 3, 1, 2))
    mask = valid[:, None, :, :].astype(jnp.float32)
    probs = probs * mask
    one_hot = one_hot * mask
    inter = jnp.sum(probs * one_hot, axis=(0, 2, 3))
    union = jnp.sum(probs, axis=(0, 2, 3)) + jnp.sum(one_hot, axis=(0, 2, 3))
    dice = (2.0 * inter + smooth) / (union + smooth)
    return 1.0 - jnp.mean(dice)


if __name__ == "__main__":
    key = jax.random.PRNGKey(0)
    k1, k2, k3, k4 = jax.random.split(key, 4)

    # Test 1: module-sized inputs (N=2, C=4, 16x16); single exact pixel tile.
    N, C, H, W = 2, 4, 16, 16
    logits = jax.random.normal(k1, (N, C, H, W), dtype=jnp.float32)
    # Include labels >= num_classes and the ignore_index itself.
    targets = jax.random.randint(k2, (N, H, W), 0, C + 2, dtype=jnp.int32)
    targets = targets.at[0, 0, 0].set(255)
    loss = jax.block_until_ready(dice_loss(logits, targets, smooth=1.0,
                                           ignore_index=255))
    ref = _dice_loss_ref(logits, targets, smooth=1.0, ignore_index=255)
    assert jnp.allclose(loss, ref, rtol=1e-4, atol=2e-5), (loss, ref)

    # Test 2: multi-tile + split pixel axis + ragged/clamped tail (N=1, C=3).
    N2, C2, H2, W2 = 1, 3, 40, 64
    logits2 = jax.random.normal(k3, (N2, C2, H2, W2), dtype=jnp.float32)
    targets2 = jax.random.randint(k4, (N2, H2, W2), 0, C2 + 2, dtype=jnp.int32)
    targets2 = targets2.at[0, 3, 5].set(255)
    loss2 = jax.block_until_ready(dice_loss(logits2, targets2, tile=512))
    ref2 = _dice_loss_ref(logits2, targets2)
    assert jnp.allclose(loss2, ref2, rtol=1e-4, atol=2e-5), (loss2, ref2)

    print("KERNEL_OK")
</pallas_src>

<mosaic_0001>
module attributes {stable_mosaic.version = 11 : i64} {
  func.func @_dice_accum_kernel(%arg0: i32, %arg1: i32, %arg2: i32, %arg3: memref<1x4x256xf32, #tpu.memory_space<vmem>>, %arg4: memref<1x1x256xi32, #tpu.memory_space<vmem>>, %arg5: memref<1x1x4x1xf32, #tpu.memory_space<vmem>>, %arg6: memref<1x1x4x1xf32, #tpu.memory_space<vmem>>) attributes {dimension_semantics = [#tpu.dimension_semantics<parallel>, #tpu.dimension_semantics<parallel>, #tpu.dimension_semantics<arbitrary>], iteration_bounds = array<i64: 2, 1, 1>, scalar_prefetch = 0 : i64, scratch_operands = 0 : i64, tpu.core_type = #tpu.core_type<tc>, window_params = [{transform_indices = @transform_0, window_bounds = array<i64: 1, 4, 256>}, {transform_indices = @transform_1, window_bounds = array<i64: 1, 1, 256>}, {transform_indices = @transform_2, window_bounds = array<i64: 1, 1, 4, 1>}, {transform_indices = @transform_3, window_bounds = array<i64: 1, 1, 4, 1>}]} {
    %c0_i32 = arith.constant 0 : i32
    %0 = arith.cmpi eq, %arg2, %c0_i32 : i32
    %1 = arith.extui %0 : i1 to i32
    %c0_i32_0 = arith.constant 0 : i32
    %2 = arith.cmpi ne, %1, %c0_i32_0 : i32
    scf.if %2 {
      %cst_30 = arith.constant 0.000000e+00 : f32
      %64 = vector.broadcast %cst_30 : f32 to vector<1x1x4x1xf32>
      %c0_31 = arith.constant 0 : index
      %c0_32 = arith.constant 0 : index
      %c0_33 = arith.constant 0 : index
      %c0_34 = arith.constant 0 : index
      %65 = vector.load %arg5[%c0_31, %c0_32, %c0_33, %c0_34] : memref<1x1x4x1xf32, #tpu.memory_space<vmem>>, vector<1x1x4x1xf32>
      tpu.vector_store %arg5[%c0_31, %c0_32, %c0_33, %c0_34], %64 {strides = array<i32>} : memref<1x1x4x1xf32, #tpu.memory_space<vmem>>, vector<1x1x4x1xf32>,
      %cst_35 = arith.constant 0.000000e+00 : f32
      %66 = vector.broadcast %cst_35 : f32 to vector<1x1x4x1xf32>
      %c0_36 = arith.constant 0 : index
      %c0_37 = arith.constant 0 : index
      %c0_38 = arith.constant 0 : index
      %c0_39 = arith.constant 0 : index
      %67 = vector.load %arg6[%c0_36, %c0_37, %c0_38, %c0_39] : memref<1x1x4x1xf32, #tpu.memory_space<vmem>>, vector<1x1x4x1xf32>
      tpu.vector_store %arg6[%c0_36, %c0_37, %c0_38, %c0_39], %66 {strides = array<i32>} : memref<1x1x4x1xf32, #tpu.memory_space<vmem>>, vector<1x1x4x1xf32>,
    } else {
    }
    %c0 = arith.constant 0 : index
    %c0_1 = arith.constant 0 : index
    %c0_2 = arith.constant 0 : index
    %3 = vector.load %arg3[%c0, %c0_1, %c0_2] : memref<1x4x256xf32, #tpu.memory_space<vmem>>, vector<1x4x256xf32>
    %4 = vector.shape_cast %3 : vector<1x4x256xf32> to vector<4x256xf32>
    %c0_3 = arith.constant 0 : index
    %c0_4 = arith.constant 0 : index
    %c0_5 = arith.constant 0 : index
    %5 = vector.load %arg4[%c0_3, %c0_4, %c0_5] : memref<1x1x256xi32, #tpu.memory_space<vmem>>, vector<1x1x256xi32>
    %6 = vector.shape_cast %5 : vector<1x1x256xi32> to vector<1x256xi32>
    %c1_i32 = arith.constant 1 : i32
    %7 = arith.muli %arg1, %c1_i32 : i32
    %8 = arith.addi %7, %arg2 : i32
    %c256_i32 = arith.constant 256 : i32
    %9 = arith.muli %8, %c256_i32 : i32
    %10 = tpu.iota {dimensions = array<i32: 1>} : vector<1x256xi32>
    %11 = vector.broadcast %9 : i32 to vector<1x256xi32>
    %12 = arith.addi %11, %10 : vector<1x256xi32>
    %c256_i32_6 = arith.constant 256 : i32
    %13 = vector.broadcast %c256_i32_6 : i32 to vector<1x256xi32>
    %14 = arith.cmpi slt, %12, %13 : vector<1x256xi32>
    %c4_i32 = arith.constant 4 : i32
    %15 = vector.broadcast %c4_i32 : i32 to vector<1x256xi32>
    %16 = arith.cmpi sge, %6, %15 : vector<1x256xi32>
    %c255_i32 = arith.constant 255 : i32
    %17 = vector.broadcast %c255_i32 : i32 to vector<1x256xi32>
    %18 = arith.select %16, %17, %6 : vector<1x256xi1>, vector<1x256xi32>
    %c255_i32_7 = arith.constant 255 : i32
    %19 = vector.broadcast %c255_i32_7 : i32 to vector<1x256xi32>
    %20 = arith.cmpi ne, %18, %19 : vector<1x256xi32>
    %21 = arith.andi %20, %14 : vector<1x256xi1>
    %c0_i32_8 = arith.constant 0 : i32
    %22 = vector.broadcast %c0_i32_8 : i32 to vector<1x256xi32>
    %23 = arith.select %21, %18, %22 : vector<1x256xi1>, vector<1x256xi32>
    %cst = arith.constant dense<0xFF800000> : vector<256xf32>
    %24 = vector.multi_reduction <maximumf>, %4, %cst [0] : vector<4x256xf32> to vector<256xf32>
    %25 = vector.shape_cast %24 : vector<256xf32> to vector<1x256xf32>
    %26 = vector.broadcast %25 : vector<1x256xf32> to vector<4x256xf32>
    %27 = arith.subf %4, %26 : vector<4x256xf32>
    %28 = math.exp %27 : vector<4x256xf32>
    %cst_9 = arith.constant dense<0.000000e+00> : vector<256xf32>
    %29 = vector.multi_reduction <add>, %28, %cst_9 [0] : vector<4x256xf32> to vector<256xf32>
    %30 = vector.shape_cast %29 : vector<256xf32> to vector<1x256xf32>
    %31 = tpu.reciprocal %30 : vector<1x256xf32> -> vector<1x256xf32>
    %32 = vector.broadcast %31 : vector<1x256xf32> to vector<4x256xf32>
    %33 = arith.mulf %28, %32 : vector<4x256xf32>
    %34 = tpu.iota {dimensions = array<i32: 0>} : vector<4x256xi32>
    %35 = vector.broadcast %23 : vector<1x256xi32> to vector<4x256xi32>
    %36 = arith.cmpi eq, %34, %35 : vector<4x256xi32>
    %37 = vector.broadcast %21 : vector<1x256xi1> to vector<4x256xi1>
    %38 = arith.andi %36, %37 : vector<4x256xi1>
    %39 = arith.extui %38 : vector<4x256xi1> to vector<4x256xi32>
    %40 = arith.sitofp %39 : vector<4x256xi32> to vector<4x256xf32>
    %cst_10 = arith.constant 0.000000e+00 : f32
    %41 = vector.shape_cast %21 : vector<1x256xi1> to vector<1x256xi1>
    %42 = vector.broadcast %41 : vector<1x256xi1> to vector<4x256xi1>
    %43 = vector.broadcast %cst_10 : f32 to vector<4x256xf32>
    %44 = arith.select %42, %33, %43 : vector<4x256xi1>, vector<4x256xf32>
    %c0_11 = arith.constant 0 : index
    %c0_12 = arith.constant 0 : index
    %c0_13 = arith.constant 0 : index
    %c0_14 = arith.constant 0 : index
    %45 = vector.load %arg5[%c0_11, %c0_12, %c0_13, %c0_14] : memref<1x1x4x1xf32, #tpu.memory_space<vmem>>, vector<1x1x4x1xf32>
    %46 = vector.shape_cast %45 : vector<1x1x4x1xf32> to vector<4x1xf32>
    %cst_15 = arith.constant 0.000000e+00 : f32
    %47 = vector.broadcast %cst_15 : f32 to vector<4x256xf32>
    %48 = arith.select %38, %33, %47 : vector<4x256xi1>, vector<4x256xf32>
    %cst_16 = arith.constant dense<0.000000e+00> : vector<4xf32>
    %49 = vector.multi_reduction <add>, %48, %cst_16 [1] : vector<4x256xf32> to vector<4xf32>
    %50 = vector.shape_cast %49 : vector<4xf32> to vector<4x1xf32>
    %51 = arith.addf %46, %50 : vector<4x1xf32>
    %c0_17 = arith.constant 0 : index
    %c0_18 = arith.constant 0 : index
    %c0_19 = arith.constant 0 : index
    %c0_20 = arith.constant 0 : index
    %52 = vector.load %arg5[%c0_17, %c0_18, %c0_19, %c0_20] : memref<1x1x4x1xf32, #tpu.memory_space<vmem>>, vector<1x1x4x1xf32>
    %53 = vector.shape_cast %52 : vector<1x1x4x1xf32> to vector<4x1xf32>
    %54 = vector.shape_cast %51 : vector<4x1xf32> to vector<1x1x4x1xf32>
    tpu.vector_store %arg5[%c0_17, %c0_18, %c0_19, %c0_20], %54 {strides = array<i32>} : memref<1x1x4x1xf32, #tpu.memory_space<vmem>>, vector<1x1x4x1xf32>,
    %c0_21 = arith.constant 0 : index
    %c0_22 = arith.constant 0 : index
    %c0_23 = arith.constant 0 : index
    %c0_24 = arith.constant 0 : index
    %55 = vector.load %arg6[%c0_21, %c0_22, %c0_23, %c0_24] : memref<1x1x4x1xf32, #tpu.memory_space<vmem>>, vector<1x1x4x1xf32>
    %56 = vector.shape_cast %55 : vector<1x1x4x1xf32> to vector<4x1xf32>
    %57 = arith.addf %44, %40 : vector<4x256xf32>
    %cst_25 = arith.constant dense<0.000000e+00> : vector<4xf32>
    %58 = vector.multi_reduction <add>, %57, %cst_25 [1] : vector<4x256xf32> to vector<4xf32>
    %59 = vector.shape_cast %58 : vector<4xf32> to vector<4x1xf32>
    %60 = arith.addf %56, %59 : vector<4x1xf32>
    %c0_26 = arith.constant 0 : index
    %c0_27 = arith.constant 0 : index
    %c0_28 = arith.constant 0 : index
    %c0_29 = arith.constant 0 : index
    %61 = vector.load %arg6[%c0_26, %c0_27, %c0_28, %c0_29] : memref<1x1x4x1xf32, #tpu.memory_space<vmem>>, vector<1x1x4x1xf32>
    %62 = vector.shape_cast %61 : vector<1x1x4x1xf32> to vector<4x1xf32>
    %63 = vector.shape_cast %60 : vector<4x1xf32> to vector<1x1x4x1xf32>
    tpu.vector_store %arg6[%c0_26, %c0_27, %c0_28, %c0_29], %63 {strides = array<i32>} : memref<1x1x4x1xf32, #tpu.memory_space<vmem>>, vector<1x1x4x1xf32>,
    return
  }
  func.func @transform_0(%arg0: i32, %arg1: i32, %arg2: i32) -> (i32, i32, i32) {
    %c1_i32 = arith.constant 1 : i32
    %0 = arith.muli %arg1, %c1_i32 : i32
    %1 = arith.addi %0, %arg2 : i32
    %c0_i32 = arith.constant 0 : i32
    %2 = arith.minsi %1, %c0_i32 : i32
    %c0_i32_0 = arith.constant 0 : i32
    %c0_i32_1 = arith.constant 0 : i32
    return %arg0, %c0_i32_0, %2 : i32, i32, i32
  }
  func.func @transform_1(%arg0: i32, %arg1: i32, %arg2: i32) -> (i32, i32, i32) {
    %c1_i32 = arith.constant 1 : i32
    %0 = arith.muli %arg1, %c1_i32 : i32
    %1 = arith.addi %0, %arg2 : i32
    %c0_i32 = arith.constant 0 : i32
    %2 = arith.minsi %1, %c0_i32 : i32
    %c0_i32_0 = arith.constant 0 : i32
    %c0_i32_1 = arith.constant 0 : i32
    return %arg0, %c0_i32_0, %2 : i32, i32, i32
  }
  func.func @transform_2(%arg0: i32, %arg1: i32, %arg2: i32) -> (i32, i32, i32, i32) {
    %c0_i32 = arith.constant 0 : i32
    %c0_i32_0 = arith.constant 0 : i32
    %c0_i32_1 = arith.constant 0 : i32
    return %arg0, %arg1, %c0_i32, %c0_i32_0 : i32, i32, i32, i32
  }
  func.func @transform_3(%arg0: i32, %arg1: i32, %arg2: i32) -> (i32, i32, i32, i32) {
    %c0_i32 = arith.constant 0 : i32
    %c0_i32_0 = arith.constant 0 : i32
    %c0_i32_1 = arith.constant 0 : i32
    return %arg0, %arg1, %c0_i32, %c0_i32_0 : i32, i32, i32, i32
  }
}

</mosaic_0001>

<bundles_post_ra>
// kernel: _dice_loss_impl.1
= control target key start
LH: loop header
LB: loop body
LE: loop exit
PB: predicated region body
PF: predicated region fallthrough
CT: control target
= control target key end

     0   :  { %s686_s12 = smov 0   ;;  %s688_s13 = smov 0   ;;  %s755_s0 = inlined_call_operand.vmem [shape: f32[2,4,256], index: 0, kind: input, shape index: {}]   ;;  %s756_s1 = inlined_call_operand.vmem [shape: s32[2,1,256], index: 1, kind: input, shape index: {}]   ;;  %s757_s2 = inlined_call_operand.vmem [shape: f32[2,1,4,1], index: 2, kind: output, shape index: {0}]   ;;  %s758_s3 = inlined_call_operand.vmem [shape: f32[2,1,4,1], index: 3, kind: output, shape index: {1}]  }
   0x1   :  { %s690_s14 = smov 0  }
   0x2 LB: > { %s33_s15 = sadd.s32 1, %s656_s13  ;;  %p592_p0 = scmp.ge.s32.totalorder %s660_s14, 1  ;;  %s660_s14 = sphi %s690_s14, %s14_s14   ;;  %s656_s13 = sphi %s688_s13, %s760_s13   ;;  %s652_s12 = sphi %s686_s12, %s759_s12  }
   0x3   : > { %p35_p1 = scmp.ge.s32.totalorder %s33_s15, 2  ;;  %p210_p2 = scmp.lt.s32.totalorder %s660_s14, 3 }
   0x5   : > { %s762_s15 = smov (%p35_p1, %s33_s15), 0  ;;  %p211_p3 = pnand %p592_p0, %p210_p2 }
   0x6   : > { %p265_p4 = scmp.lt.s32.totalorder (!%p211_p3), %s652_s12, 1  ;;  %vm351_vm0 = vcmask (!%p211_p3), 1043456   ;;  %vm310_vm1 = vcmask (!%p211_p3), 3072   ;;  %v662_v4 = vmov (!%p211_p3), 0.0   ;;  %v663_v20 = vmov (!%p211_p3), 1966171168  }
   0x7   : > { %214 = sbr.rel (%p211_p3) target bundleno = 235 (0xeb), region = 28  ;;  %v332_v21 = vunpack.c.l.s4 (!%p211_p3), %v663_v20  ;;  %v334_v22 = vlaneseq (!%p211_p3)  ;;  %v664_v26 = vmov (!%p211_p3), 1   ;;  %v665_v50 = vmov (!%p211_p3), 0  }
   0x8   : > { %v330_v27 = vcombine.low (!%p211_p3), %v664_v26, %v664_v26 }
   0x9   : > { %v333_v23 = vunpack.c.0.s8 (!%p211_p3), %v332_v21  ;;  %v335_v24 = vshrl.u32 (!%p211_p3), %v334_v22, 7 }
   0xb   : > { %v336_v28 = vsub.s32 (!%p211_p3), %v333_v23, %v335_v24  ;;  %v401_v48 = vsub.s32 (!%p211_p3), 0, %v335_v24  ;;  %v405_v52 = vsub.s32 (!%p211_p3), 1, %v335_v24 }
   0xd   : > { %v337_v34 = vrot.slane (!%p211_p3), %v330_v27, %v336_v28 }
   0xe   : > { %s764_s12 = smov (!%p265_p4, %s652_s12), 1 }
   0xf   : > { %s602_s16 = sshll.u32 %s764_s12, 3  ;;  %s596_s20 = sshll.u32 %s764_s12, 2  ;;  %v344_v39 = vrot.slane %v337_v34, %v336_v28 }
  0x10   : > { %s272_s19 = scalar_lea.vmem %s755_s0, %s602_s16  ;;  %s717_s23 = scalar_lea.vmem %s757_s2, %s596_s20 }
  0x11   : > { %v313_v0 = vld [vmem:[%s272_s19] sm:$0xff]  ;;  %311 = vst.msk [vmem:[%s717_s23] sm:$0xf] %vm310_vm1, %v662_v4  ;;  %s595_s24 = sshll.u32 %s764_s12, 1  ;;  %vm345_vm4 = vcmp.ne.s32.totalorder %v344_v39, 0  ;;  %s305_s30 = scalar_lea.vmem %s758_s3, %s596_s20 }
  0x12   : > { %v349_v1 = vcombine.high %v313_v0, %v313_v0  ;;  %v352_v2 = vsel %vm351_vm0, %v313_v0, -inf  ;;  %s287_s27 = scalar_lea.vmem %s756_s1, %s595_s24  ;;  %312 = vst.msk [vmem:[%s305_s30] sm:$0xf] %vm310_vm1, %v662_v4 }
  0x13   : > { %v353_v3 = vrot.slane %v352_v2, 4  ;;  %v314_v32 = vld [vmem:[%s287_s27] sm:$0x3] }
  0x14   : > { %v359_v5 = vsel %vm351_vm0, %v349_v1, -inf  ;;  %vm325_vm2 = vcmp.ge.s32.totalorder %v314_v32, 4 }
  0x15   : > { %v354_v6 = vmax.f32 %v352_v2, %v353_v3  ;;  %v360_v7 = vrot.slane %v359_v5, 4  ;;  %v326_v42 = vsel %vm325_vm2, 255, %v314_v32 }
  0x16   : > { %vm327_vm3 = vcmp.ne.s32.totalorder %v326_v42, 255 }
  0x17   : > { %v355_v8 = vrot.slane %v354_v6, 2  ;;  %v361_v9 = vmax.f32 %v359_v5, %v360_v7  ;;  %vm346_vm5 = vmand %vm327_vm3, %vm345_vm4 }
  0x18   : > { %v347_v49 = vsel %vm346_vm5, %v326_v42, 0  ;;  %v409_v51 = vsel %vm346_vm5, 1, %v665_v50 }
  0x19   : > { %v356_v10 = vmax.f32 %v354_v6, %v355_v8  ;;  %v362_v11 = vrot.slane %v361_v9, 2  ;;  %v402_v53 = vrot.slane %v347_v49, %v401_v48  ;;  %v413_v54 = vrot.slane %v409_v51, %v401_v48 }
  0x1a   : > { %v406_v55 = vrot.slane %v347_v49, %v405_v52  ;;  %v417_v56 = vrot.slane %v409_v51, %v405_v52 }
  0x1b   : > { %v357_v12 = vrot.slane %v356_v10, 1  ;;  %v363_v13 = vmax.f32 %v361_v9, %v362_v11  ;;  %vm407_vm6 = vcmp.eq.s32.totalorder %v335_v24, %v402_v53  ;;  %vm418_vm7 = vcmp.eq.s32.totalorder %v413_v54, 1 }
  0x1c   : > { %vm408_vm8 = vcmp.eq.s32.totalorder %v335_v24, %v406_v55  ;;  %vm419_vm9 = vcmp.eq.s32.totalorder %v417_v56, 1  ;;  %vm420_vm10 = vmand %vm407_vm6, %vm418_vm7 }
  0x1d   : > { %v358_v14 = vmax.f32 %v356_v10, %v357_v12  ;;  %v364_v15 = vrot.slane %v363_v13, 1  ;;  %v598_v61 = vsel %vm420_vm10, 1.0, %v662_v4  ;;  %vm421_vm11 = vmand %vm408_vm8, %vm419_vm9 }
  0x1e   : > { %v599_v62 = vsel %vm421_vm11, 1.0, %v662_v4 }
  0x1f   : > { %v365_v16 = vmax.f32 %v363_v13, %v364_v15  ;;  %v431_v13 = vld [vmem:[%s717_s23] sm:$0xf] }
  0x21   : > { %v368_v17 = vcombine.low %v358_v14, %v365_v16  ;;  %v442_v16 = vld [vmem:[%s305_s30] sm:$0xf] }
  0x23   : > { %v370_v18 = vsub.f32 %v313_v0, %v368_v17 }
  0x25   : > { %v371_v19 = vmul.f32 1.442695, %v370_v18 }
  0x27   : > { %632 = vpow2.f32 %v371_v19 }
  0x31   : > { %v633_v25 = vpop.eup %632 }
  0x32   : > { %v374_v29 = vcombine.high %v633_v25, %v633_v25  ;;  %v376_v30 = vsel %vm351_vm0, %v633_v25, 0.0 }
  0x33   : > { %v377_v31 = vrot.slane %v376_v30, 4 }
  0x34   : > { %v383_v33 = vsel %vm351_vm0, %v374_v29, 0.0 }
  0x35   : > { %v378_v35 = vadd.f32 %v377_v31, %v376_v30  ;;  %v384_v36 = vrot.slane %v383_v33, 4 }
  0x37   : > { %v379_v37 = vrot.slane %v378_v35, 2  ;;  %v385_v38 = vadd.f32 %v384_v36, %v383_v33 }
  0x39   : > { %v380_v40 = vadd.f32 %v379_v37, %v378_v35  ;;  %v386_v41 = vrot.slane %v385_v38, 2 }
  0x3b   : > { %v381_v43 = vrot.slane %v380_v40, 1  ;;  %v387_v44 = vadd.f32 %v386_v41, %v385_v38 }
  0x3d   : > { %v382_v45 = vadd.f32 %v381_v43, %v380_v40  ;;  %v388_v46 = vrot.slane %v387_v44, 1 }
  0x3f   : > { %v389_v47 = vadd.f32 %v388_v46, %v387_v44  ;;  %634 = vrcp.f32 %v382_v45 }
  0x41   : > { %636 = vrcp.f32 %v389_v47 }
  0x49   : > { %v635_v57 = vpop.eup %634 }
  0x4b   : > { %v637_v58 = vpop.eup %636 }
  0x4c   : > { %v394_v59 = vcombine.low %v635_v57, %v637_v58 }
  0x4e   : > { %v396_v60 = vmul.f32 %v633_v25, %v394_v59 }
  0x50   : > { %v427_v63 = vcombine.high %v396_v60, %v396_v60  ;;  %v429_v0 = vsel %vm418_vm7, %v396_v60, 0.0  ;;  %v432_v1 = vsel %vm420_vm10, %v396_v60, 0.0 }
  0x51   : > { %v434_v2 = vsel %vm351_vm0, %v432_v1, 0.0  ;;  %v443_v3 = vadd.f32 %v598_v61, %v429_v0 }
  0x52   : > { %v433_v5 = vsel %vm421_vm11, %v427_v63, 0.0  ;;  %v430_v6 = vsel %vm419_vm9, %v427_v63, 0.0 }
  0x53   : > { %v435_v7 = vsel %vm351_vm0, %v433_v5, 0.0  ;;  %v444_v8 = vadd.f32 %v599_v62, %v430_v6  ;;  %v445_v9 = vsel %vm351_vm0, %v443_v3, 0.0 }
  0x54   : > { %v436_v10 = vadd.f32 %v435_v7, %v434_v2 }
  0x55   : > { %v446_v11 = vsel %vm351_vm0, %v444_v8, 0.0 }
  0x56   : > { %437 = vadd.xlane.f32.xlu0 %v436_v10  ;;  %v447_v12 = vadd.f32 %v446_v11, %v445_v9 }
  0x5a   : > { %448 = vadd.xlane.f32.xlu0 %v447_v12 }
  0xe3   : > { %v438_v14 = vpop.xlane.xlu0 %437 }
  0xe4   : > { %v439_v15 = vadd.f32 %v438_v14, %v431_v13 }
  0xe6   : > { %441 = vst.msk [vmem:[%s717_s23] sm:$0xf] %vm310_vm1, %v439_v15 }
  0xe7   : > { %v449_v17 = vpop.xlane.xlu0 %448 }
  0xe8   : > { %v450_v18 = vadd.f32 %v449_v17, %v442_v16 }
  0xea   : > { %451 = vst.msk [vmem:[%s305_s30] sm:$0xf] %vm310_vm1, %v450_v18 }
  0xeb PF: > { %s14_s14 = sadd.s32 1, %s660_s14   ;;  %s759_s12 = smov %s656_s13 }
  0xec   : > { %p11_p5 = scmp.ge.s32.totalorder %s14_s14, 4   ;;  %s760_s13 = smov %s762_s15 }
  0xee   :  { %13 = sbr.rel (!%p11_p5) target bundleno = 2 (0x2), region = 77 }

</bundles_post_ra>
